<compile_context>
chip_gen: v5e
topology: v5e:2x2
jax: 0.10.0
libtpu: 0.0.40
codegen_flags: <defaults>
</compile_context>

<pallas_src>
import functools

import jax
import jax.numpy as jnp
from jax.experimental import pallas as pl
from jax.experimental.pallas import tpu as pltpu

EPS = 1e-5


# ----------------------------------------------------------------------------
# Generation-aware budgets
# ----------------------------------------------------------------------------
def _vmem_capacity_bytes():
    try:
        cap = getattr(pltpu.get_tpu_info(), "vmem_capacity_bytes", None)
        if cap:
            return int(cap)
    except Exception:
        pass
    return 64 * 1024 * 1024  # conservative fallback == v7x per-core VMEM


def _budgets():
    cap = _vmem_capacity_bytes()
    # Blocks: ~8 MiB on v5e/v6e (128 MiB physical), ~4 MiB on v7x (64 MiB).
    block_cap = max(2 * 1024 * 1024, min(8 * 1024 * 1024, cap // 16))
    # Explicit scoped-VMEM override (apply pass needs ~4x block for in+out buffers).
    vmem_limit = min((cap * 3) // 4, 112 * 1024 * 1024)
    # Single-pass fused path only when x (f32 bytes) is a small fraction of VMEM.
    fused_cap = cap // 12
    return block_cap, vmem_limit, fused_cap


# ----------------------------------------------------------------------------
# Kernels
# ----------------------------------------------------------------------------
def _make_fused_kernel(num_channels, inv_cnt):
    """Single-pass kernel: x resident in VMEM; stats + closed-form BN fuse + apply."""

    def _fused_kernel(gb_ref, x_ref, o_ref):
        # gb_ref: (4, C) SMEM rows [g1; g2; g3; b3].
        # x_ref / o_ref: (N, C, M) full-array VMEM blocks.
        for c in range(num_channels):  # C is tiny & static (== 2)
            xc = x_ref[:, c, :].astype(jnp.float32)                  # (N, M)
            tot = jnp.sum(xc, axis=0, keepdims=True)                 # (1, M)
            tot = jnp.sum(tot, axis=1, keepdims=True)                # (1, 1)
            sq = jnp.sum(xc * xc, axis=0, keepdims=True)
            sq = jnp.sum(sq, axis=1, keepdims=True)                  # (1, 1)
            mean = tot * inv_cnt
            var = jnp.maximum(sq * inv_cnt - mean * mean, 0.0)
            g1 = gb_ref[0, c]
            g2 = gb_ref[1, c]
            g3 = gb_ref[2, c]
            b3 = gb_ref[3, c]
            inv0 = jax.lax.rsqrt(var + EPS)
            t1 = g1 * inv0
            var1 = t1 * t1 * var          # exact variance after BN stage 1
            inv1 = jax.lax.rsqrt(var1 + EPS)
            t2 = g2 * inv1
            var2 = t2 * t2 * var1         # exact variance after BN stage 2
            inv2 = jax.lax.rsqrt(var2 + EPS)
            scale = (g1 * g2 * g3) * inv0 * inv1 * inv2              # (1, 1)
            shift = b3 - mean * scale                                # (1, 1)
            o_ref[:, c, :] = (xc * scale + shift).astype(o_ref.dtype)

    return _fused_kernel


def _stats_kernel(x_ref, acc_ref):
    """Per-sample, lane-resolved per-channel sum / sum-of-squares.

    x_ref:   (1, C, s_tile, LANE) VMEM block.
    acc_ref: (1, 2, C, LANE) partial accumulator for this batch sample,
             resident across the spatial grid axis (constant index_map on it).
    """
    @pl.when(pl.program_id(1) == 0)
    def _init():
        acc_ref[...] = jnp.zeros_like(acc_ref)

    x = x_ref[...].astype(jnp.float32)
    xs = jnp.sum(x, axis=0)                 # (C, s_tile, LANE)
    xq = jnp.sum(x * x, axis=0)             # (C, s_tile, LANE)
    part = jnp.stack([jnp.sum(xs, axis=1),  # (C, LANE) sum
                      jnp.sum(xq, axis=1)])  # (C, LANE) sum of squares
    acc_ref[...] += part[None]              # single RMW on the resident block


def _make_apply_kernel(num_channels):
    def _apply_kernel(ss_ref, x_ref, o_ref):
        # ss_ref: (2, C) fused [scale; shift] in SMEM (scalar reads).
        # x_ref / o_ref: (1, C, s_tile, LANE) VMEM blocks.
        for c in range(num_channels):  # C is tiny & static (== 2)
            xc = x_ref[:, c, :, :].astype(jnp.float32)
            o_ref[:, c, :, :] = (xc * ss_ref[0, c] + ss_ref[1, c]).astype(o_ref.dtype)

    return _apply_kernel


# ----------------------------------------------------------------------------
# Layout picking (two-pass path)
# ----------------------------------------------------------------------------
def _round_up(x, m):
    return (x + m - 1) // m * m


def _pick_layout(c, m, itemsize, block_cap):
    """Return (lane, sub_pad, s_tile) for x reshaped to (N, C, sub_pad, lane)."""
    m128 = _round_up(max(m, 1), 128)
    lane = 128
    for cand in (2048, 1024, 512, 256):
        if m128 % cand == 0 and c * 8 * cand * itemsize <= block_cap:
            lane = cand
            break
    sub = m128 // lane
    s_cap = max(1, block_cap // (c * lane * itemsize))   # batch block dim == 1
    if sub <= s_cap:
        s_tile = sub                 # whole (padded) spatial axis in one block
        sub_pad = sub
    else:
        s_tile = max(8, (s_cap // 8) * 8)        # keep (8,128)-aligned blocks
        sub_pad = _round_up(sub, s_tile)         # zero-pad so the grid is exact
    return lane, sub_pad, s_tile


def _fuse_scale_shift(total, total_sq, cnt, params):
    """Closed-form fusion of the three BN stages into per-channel scale/shift."""
    mean = total / cnt
    var = jnp.maximum(total_sq / cnt - mean * mean, 0.0)   # one-pass, clamped
    g1 = params["g1"].astype(jnp.float32)
    g2 = params["g2"].astype(jnp.float32)
    g3 = params["g3"].astype(jnp.float32)
    b3 = params["b3"].astype(jnp.float32)
    inv0 = jax.lax.rsqrt(var + EPS)
    var1 = (g1 * inv0) ** 2 * var
    inv1 = jax.lax.rsqrt(var1 + EPS)
    var2 = (g2 * inv1) ** 2 * var1
    inv2 = jax.lax.rsqrt(var2 + EPS)
    scale = g1 * g2 * g3 * inv0 * inv1 * inv2
    shift = b3 - mean * scale                    # b1, b2 cancel exactly
    return jnp.stack([scale, shift]).astype(jnp.float32)   # (2, C)


# ----------------------------------------------------------------------------
# Wrapper
# ----------------------------------------------------------------------------
def model_with_bn_forward(x, params, *, force_two_pass=False):
    """x: (N, C, *spatial) array; params: dict of (C,) gamma/beta arrays."""
    n, c = x.shape[0], x.shape[1]
    m = 1
    for d in x.shape[2:]:
        m *= d
    itemsize = jnp.dtype(x.dtype).itemsize
    block_cap, vmem_limit, fused_cap = _budgets()

    x3 = x.reshape(n, c, m)          # free reshape, NO transpose

    # ---- small/medium inputs: single fused pass, x resident in VMEM --------
    if (not force_two_pass) and n * c * m * 4 <= fused_cap:
        gb = jnp.stack([params["g1"], params["g2"], params["g3"],
                        params["b3"]]).astype(jnp.float32)            # (4, C)
        out3 = pl.pallas_call(
            _make_fused_kernel(c, 1.0 / float(n * m)),
            out_shape=jax.ShapeDtypeStruct((n, c, m), x.dtype),
            grid=(1,),
            in_specs=[pl.BlockSpec(memory_space=pltpu.MemorySpace.SMEM),
                      pl.BlockSpec((n, c, m), lambda i: (0, 0, 0))],
            out_specs=pl.BlockSpec((n, c, m), lambda i: (0, 0, 0)),
            compiler_params=pltpu.CompilerParams(
                dimension_semantics=("arbitrary",),
                vmem_limit_bytes=int(vmem_limit)),
        )(gb, x3)
        return out3.reshape(x.shape)

    # ---- large inputs: two tiled HBM sweeps (stats + apply) ----------------
    lane, sub_pad, s_tile = _pick_layout(c, m, itemsize, block_cap)
    grid_s = sub_pad // s_tile
    m_pad = sub_pad * lane
    if m_pad != m:
        # Zero padding keeps sum/sumsq exact (finalize divides by the real count).
        x3 = jnp.pad(x3, ((0, 0), (0, 0), (0, m_pad - m)))
    x4 = x3.reshape(n, c, sub_pad, lane)

    # pass 1: per-sample partial sums/sumsq (batch axis parallel -> megacore).
    acc = pl.pallas_call(
        _stats_kernel,
        out_shape=jax.ShapeDtypeStruct((n, 2, c, lane), jnp.float32),
        grid=(n, grid_s),
        in_specs=[pl.BlockSpec((1, c, s_tile, lane), lambda b, s: (b, 0, s, 0))],
        out_specs=pl.BlockSpec((1, 2, c, lane), lambda b, s: (b, 0, 0, 0)),
        compiler_params=pltpu.CompilerParams(
            dimension_semantics=("parallel", "arbitrary"),
            vmem_limit_bytes=int(vmem_limit)),
    )(x4)

    # tiny XLA finalize: reduce partials, fuse the 3 BNs into scale/shift.
    sums = jnp.sum(acc, axis=(0, 3))                               # (2, C)
    ss = _fuse_scale_shift(sums[0], sums[1], jnp.float32(n * m), params)

    # pass 2: fused affine apply (fully parallel).
    out4 = pl.pallas_call(
        _make_apply_kernel(c),
        out_shape=jax.ShapeDtypeStruct((n, c, sub_pad, lane), x.dtype),
        grid=(n, grid_s),
        in_specs=[pl.BlockSpec(memory_space=pltpu.MemorySpace.SMEM),
                  pl.BlockSpec((1, c, s_tile, lane), lambda b, s: (b, 0, s, 0))],
        out_specs=pl.BlockSpec((1, c, s_tile, lane), lambda b, s: (b, 0, s, 0)),
        compiler_params=pltpu.CompilerParams(
            dimension_semantics=("parallel", "parallel"),
            vmem_limit_bytes=int(vmem_limit)),
    )(ss, x4)

    out3 = out4.reshape(n, c, m_pad)
    if m_pad != m:
        out3 = out3[:, :, :m]
    return out3.reshape(x.shape)


# ----------------------------------------------------------------------------
# Unfused pure-JAX reference (structurally different from the kernel path)
# ----------------------------------------------------------------------------
def _reference(x, params):
    n, c = x.shape[0], x.shape[1]
    y = x.reshape(n, c, -1).astype(jnp.float32)

    def bn(y, g, b):
        mean = jnp.mean(y, axis=(0, 2), keepdims=True)
        var = jnp.mean((y - mean) ** 2, axis=(0, 2), keepdims=True)
        gg = g.reshape(1, -1, 1).astype(jnp.float32)
        bb = b.reshape(1, -1, 1).astype(jnp.float32)
        return (y - mean) * jax.lax.rsqrt(var + EPS) * gg + bb

    y = bn(y, params["g1"], params["b1"])
    y = bn(y, params["g2"], params["b2"])
    y = bn(y, params["g3"], params["b3"])
    return y.reshape(x.shape)


if __name__ == "__main__":
    key = jax.random.PRNGKey(0)
    kx, k1, k2, k3, k4, k5, k6, kx2 = jax.random.split(key, 8)

    C = 2  # BatchNorm1d/2d/3d(2) -> 2 channels
    params = {
        "g1": 1.0 + 0.1 * jax.random.normal(k1, (C,), jnp.float32),
        "b1": 0.1 * jax.random.normal(k2, (C,), jnp.float32),
        "g2": 1.0 + 0.1 * jax.random.normal(k3, (C,), jnp.float32),
        "b2": 0.1 * jax.random.normal(k4, (C,), jnp.float32),
        "g3": 1.0 + 0.1 * jax.random.normal(k5, (C,), jnp.float32),
        "b3": 0.1 * jax.random.normal(k6, (C,), jnp.float32),
    }

    # Path 1: small NCHW input -> fused single-pass kernel (x resident in VMEM).
    x = jax.random.normal(kx, (2, C, 16, 16), dtype=jnp.float32)
    fwd = jax.jit(model_with_bn_forward)
    out = jax.block_until_ready(fwd(x, params))
    ref = _reference(x, params)
    assert out.shape == x.shape
    assert jnp.allclose(out, ref, atol=1e-4, rtol=1e-4), (
        float(jnp.max(jnp.abs(out - ref))))

    # Path 2: force the tiled two-pass path on an odd shape (exercises padding,
    # batch-parallel partial accumulators, and the SMEM scale/shift apply).
    x2 = jax.random.normal(kx2, (3, C, 7, 9), dtype=jnp.float32)
    fwd2 = jax.jit(functools.partial(model_with_bn_forward, force_two_pass=True))
    out2 = jax.block_until_ready(fwd2(x2, params))
    ref2 = _reference(x2, params)
    assert out2.shape == x2.shape
    assert jnp.allclose(out2, ref2, atol=1e-4, rtol=1e-4), (
        float(jnp.max(jnp.abs(out2 - ref2))))

    print("KERNEL_OK")
</pallas_src>

<mosaic_0001>
module attributes {stable_mosaic.version = 11 : i64} {
  func.func @_fused_kernel(%arg0: i32, %arg1: memref<4x2xf32, #tpu.memory_space<smem>>, %arg2: memref<2x2x256xf32, #tpu.memory_space<vmem>>, %arg3: memref<2x2x256xf32, #tpu.memory_space<vmem>>) attributes {dimension_semantics = [#tpu.dimension_semantics<arbitrary>], iteration_bounds = array<i64: 1>, scalar_prefetch = 0 : i64, scratch_operands = 0 : i64, tpu.core_type = #tpu.core_type<tc>, window_params = [{transform_indices = @transform_0, window_bounds = array<i64: 4, 2>}, {pipeline_mode = #tpu.pipeline_mode<synchronous>, transform_indices = @transform_1, window_bounds = array<i64: 2, 2, 256>}, {pipeline_mode = #tpu.pipeline_mode<synchronous>, transform_indices = @transform_2, window_bounds = array<i64: 2, 2, 256>}]} {
    %c0 = arith.constant 0 : index
    %c0_0 = arith.constant 0 : index
    %c0_1 = arith.constant 0 : index
    %0 = vector.load %arg2[%c0, %c0_0, %c0_1] : memref<2x2x256xf32, #tpu.memory_space<vmem>>, vector<2x1x256xf32>
    %1 = vector.shape_cast %0 : vector<2x1x256xf32> to vector<2x256xf32>
    %cst = arith.constant dense<0.000000e+00> : vector<256xf32>
    %2 = vector.multi_reduction <add>, %1, %cst [0] : vector<2x256xf32> to vector<256xf32>
    %3 = vector.shape_cast %2 : vector<256xf32> to vector<1x256xf32>
    %cst_2 = arith.constant dense<0.000000e+00> : vector<1xf32>
    %4 = vector.multi_reduction <add>, %3, %cst_2 [1] : vector<1x256xf32> to vector<1xf32>
    %5 = vector.shape_cast %4 : vector<1xf32> to vector<1x1xf32>
    %6 = arith.mulf %1, %1 : vector<2x256xf32>
    %cst_3 = arith.constant dense<0.000000e+00> : vector<256xf32>
    %7 = vector.multi_reduction <add>, %6, %cst_3 [0] : vector<2x256xf32> to vector<256xf32>
    %8 = vector.shape_cast %7 : vector<256xf32> to vector<1x256xf32>
    %cst_4 = arith.constant dense<0.000000e+00> : vector<1xf32>
    %9 = vector.multi_reduction <add>, %8, %cst_4 [1] : vector<1x256xf32> to vector<1xf32>
    %10 = vector.shape_cast %9 : vector<1xf32> to vector<1x1xf32>
    %cst_5 = arith.constant 0.001953125 : f32
    %11 = vector.broadcast %cst_5 : f32 to vector<1x1xf32>
    %12 = arith.mulf %5, %11 : vector<1x1xf32>
    %cst_6 = arith.constant 0.001953125 : f32
    %13 = vector.broadcast %cst_6 : f32 to vector<1x1xf32>
    %14 = arith.mulf %10, %13 : vector<1x1xf32>
    %15 = arith.mulf %12, %12 : vector<1x1xf32>
    %16 = arith.subf %14, %15 : vector<1x1xf32>
    %cst_7 = arith.constant 0.000000e+00 : f32
    %17 = vector.broadcast %cst_7 : f32 to vector<1x1xf32>
    %18 = arith.maximumf %16, %17 : vector<1x1xf32>
    %c0_8 = arith.constant 0 : index
    %c0_9 = arith.constant 0 : index
    %19 = memref.load %arg1[%c0_8, %c0_9] : memref<4x2xf32, #tpu.memory_space<smem>>
    %c1 = arith.constant 1 : index
    %c0_10 = arith.constant 0 : index
    %20 = memref.load %arg1[%c1, %c0_10] : memref<4x2xf32, #tpu.memory_space<smem>>
    %c2 = arith.constant 2 : index
    %c0_11 = arith.constant 0 : index
    %21 = memref.load %arg1[%c2, %c0_11] : memref<4x2xf32, #tpu.memory_space<smem>>
    %c3 = arith.constant 3 : index
    %c0_12 = arith.constant 0 : index
    %22 = memref.load %arg1[%c3, %c0_12] : memref<4x2xf32, #tpu.memory_space<smem>>
    %cst_13 = arith.constant 9.99999974E-6 : f32
    %23 = vector.broadcast %cst_13 : f32 to vector<1x1xf32>
    %24 = arith.addf %18, %23 : vector<1x1xf32>
    %25 = math.rsqrt %24 : vector<1x1xf32>
    %26 = vector.broadcast %19 : f32 to vector<1x1xf32>
    %27 = arith.mulf %26, %25 : vector<1x1xf32>
    %28 = arith.mulf %27, %27 : vector<1x1xf32>
    %29 = arith.mulf %28, %18 : vector<1x1xf32>
    %cst_14 = arith.constant 9.99999974E-6 : f32
    %30 = vector.broadcast %cst_14 : f32 to vector<1x1xf32>
    %31 = arith.addf %29, %30 : vector<1x1xf32>
    %32 = math.rsqrt %31 : vector<1x1xf32>
    %33 = vector.broadcast %20 : f32 to vector<1x1xf32>
    %34 = arith.mulf %33, %32 : vector<1x1xf32>
    %35 = arith.mulf %34, %34 : vector<1x1xf32>
    %36 = arith.mulf %35, %29 : vector<1x1xf32>
    %cst_15 = arith.constant 9.99999974E-6 : f32
    %37 = vector.broadcast %cst_15 : f32 to vector<1x1xf32>
    %38 = arith.addf %36, %37 : vector<1x1xf32>
    %39 = math.rsqrt %38 : vector<1x1xf32>
    %40 = arith.mulf %19, %20 : f32
    %41 = arith.mulf %40, %21 : f32
    %42 = vector.broadcast %41 : f32 to vector<1x1xf32>
    %43 = arith.mulf %42, %25 : vector<1x1xf32>
    %44 = arith.mulf %43, %32 : vector<1x1xf32>
    %45 = arith.mulf %44, %39 : vector<1x1xf32>
    %46 = arith.mulf %12, %45 : vector<1x1xf32>
    %47 = vector.broadcast %22 : f32 to vector<1x1xf32>
    %48 = arith.subf %47, %46 : vector<1x1xf32>
    %49 = vector.broadcast %45 : vector<1x1xf32> to vector<2x256xf32>
    %50 = arith.mulf %1, %49 : vector<2x256xf32>
    %51 = vector.broadcast %48 : vector<1x1xf32> to vector<2x256xf32>
    %52 = arith.addf %50, %51 : vector<2x256xf32>
    %c0_16 = arith.constant 0 : index
    %c0_17 = arith.constant 0 : index
    %c0_18 = arith.constant 0 : index
    %53 = vector.load %arg3[%c0_16, %c0_17, %c0_18] : memref<2x2x256xf32, #tpu.memory_space<vmem>>, vector<2x1x256xf32>
    %54 = vector.shape_cast %53 : vector<2x1x256xf32> to vector<2x256xf32>
    %55 = vector.shape_cast %52 : vector<2x256xf32> to vector<2x1x256xf32>
    tpu.vector_store %arg3[%c0_16, %c0_17, %c0_18], %55 {strides = array<i32>} : memref<2x2x256xf32, #tpu.memory_space<vmem>>, vector<2x1x256xf32>,
    %c0_19 = arith.constant 0 : index
    %c1_20 = arith.constant 1 : index
    %c0_21 = arith.constant 0 : index
    %56 = vector.load %arg2[%c0_19, %c1_20, %c0_21] : memref<2x2x256xf32, #tpu.memory_space<vmem>>, vector<2x1x256xf32>
    %57 = vector.shape_cast %56 : vector<2x1x256xf32> to vector<2x256xf32>
    %cst_22 = arith.constant dense<0.000000e+00> : vector<256xf32>
    %58 = vector.multi_reduction <add>, %57, %cst_22 [0] : vector<2x256xf32> to vector<256xf32>
    %59 = vector.shape_cast %58 : vector<256xf32> to vector<1x256xf32>
    %cst_23 = arith.constant dense<0.000000e+00> : vector<1xf32>
    %60 = vector.multi_reduction <add>, %59, %cst_23 [1] : vector<1x256xf32> to vector<1xf32>
    %61 = vector.shape_cast %60 : vector<1xf32> to vector<1x1xf32>
    %62 = arith.mulf %57, %57 : vector<2x256xf32>
    %cst_24 = arith.constant dense<0.000000e+00> : vector<256xf32>
    %63 = vector.multi_reduction <add>, %62, %cst_24 [0] : vector<2x256xf32> to vector<256xf32>
    %64 = vector.shape_cast %63 : vector<256xf32> to vector<1x256xf32>
    %cst_25 = arith.constant dense<0.000000e+00> : vector<1xf32>
    %65 = vector.multi_reduction <add>, %64, %cst_25 [1] : vector<1x256xf32> to vector<1xf32>
    %66 = vector.shape_cast %65 : vector<1xf32> to vector<1x1xf32>
    %cst_26 = arith.constant 0.001953125 : f32
    %67 = vector.broadcast %cst_26 : f32 to vector<1x1xf32>
    %68 = arith.mulf %61, %67 : vector<1x1xf32>
    %cst_27 = arith.constant 0.001953125 : f32
    %69 = vector.broadcast %cst_27 : f32 to vector<1x1xf32>
    %70 = arith.mulf %66, %69 : vector<1x1xf32>
    %71 = arith.mulf %68, %68 : vector<1x1xf32>
    %72 = arith.subf %70, %71 : vector<1x1xf32>
    %cst_28 = arith.constant 0.000000e+00 : f32
    %73 = vector.broadcast %cst_28 : f32 to vector<1x1xf32>
    %74 = arith.maximumf %72, %73 : vector<1x1xf32>
    %c0_29 = arith.constant 0 : index
    %c1_30 = arith.constant 1 : index
    %75 = memref.load %arg1[%c0_29, %c1_30] : memref<4x2xf32, #tpu.memory_space<smem>>
    %c1_31 = arith.constant 1 : index
    %c1_32 = arith.constant 1 : index
    %76 = memref.load %arg1[%c1_31, %c1_32] : memref<4x2xf32, #tpu.memory_space<smem>>
    %c2_33 = arith.constant 2 : index
    %c1_34 = arith.constant 1 : index
    %77 = memref.load %arg1[%c2_33, %c1_34] : memref<4x2xf32, #tpu.memory_space<smem>>
    %c3_35 = arith.constant 3 : index
    %c1_36 = arith.constant 1 : index
    %78 = memref.load %arg1[%c3_35, %c1_36] : memref<4x2xf32, #tpu.memory_space<smem>>
    %cst_37 = arith.constant 9.99999974E-6 : f32
    %79 = vector.broadcast %cst_37 : f32 to vector<1x1xf32>
    %80 = arith.addf %74, %79 : vector<1x1xf32>
    %81 = math.rsqrt %80 : vector<1x1xf32>
    %82 = vector.broadcast %75 : f32 to vector<1x1xf32>
    %83 = arith.mulf %82, %81 : vector<1x1xf32>
    %84 = arith.mulf %83, %83 : vector<1x1xf32>
    %85 = arith.mulf %84, %74 : vector<1x1xf32>
    %cst_38 = arith.constant 9.99999974E-6 : f32
    %86 = vector.broadcast %cst_38 : f32 to vector<1x1xf32>
    %87 = arith.addf %85, %86 : vector<1x1xf32>
    %88 = math.rsqrt %87 : vector<1x1xf32>
    %89 = vector.broadcast %76 : f32 to vector<1x1xf32>
    %90 = arith.mulf %89, %88 : vector<1x1xf32>
    %91 = arith.mulf %90, %90 : vector<1x1xf32>
    %92 = arith.mulf %91, %85 : vector<1x1xf32>
    %cst_39 = arith.constant 9.99999974E-6 : f32
    %93 = vector.broadcast %cst_39 : f32 to vector<1x1xf32>
    %94 = arith.addf %92, %93 : vector<1x1xf32>
    %95 = math.rsqrt %94 : vector<1x1xf32>
    %96 = arith.mulf %75, %76 : f32
    %97 = arith.mulf %96, %77 : f32
    %98 = vector.broadcast %97 : f32 to vector<1x1xf32>
    %99 = arith.mulf %98, %81 : vector<1x1xf32>
    %100 = arith.mulf %99, %88 : vector<1x1xf32>
    %101 = arith.mulf %100, %95 : vector<1x1xf32>
    %102 = arith.mulf %68, %101 : vector<1x1xf32>
    %103 = vector.broadcast %78 : f32 to vector<1x1xf32>
    %104 = arith.subf %103, %102 : vector<1x1xf32>
    %105 = vector.broadcast %101 : vector<1x1xf32> to vector<2x256xf32>
    %106 = arith.mulf %57, %105 : vector<2x256xf32>
    %107 = vector.broadcast %104 : vector<1x1xf32> to vector<2x256xf32>
    %108 = arith.addf %106, %107 : vector<2x256xf32>
    %c0_40 = arith.constant 0 : index
    %c1_41 = arith.constant 1 : index
    %c0_42 = arith.constant 0 : index
    %109 = vector.load %arg3[%c0_40, %c1_41, %c0_42] : memref<2x2x256xf32, #tpu.memory_space<vmem>>, vector<2x1x256xf32>
    %110 = vector.shape_cast %109 : vector<2x1x256xf32> to vector<2x256xf32>
    %111 = vector.shape_cast %108 : vector<2x256xf32> to vector<2x1x256xf32>
    tpu.vector_store %arg3[%c0_40, %c1_41, %c0_42], %111 {strides = array<i32>} : memref<2x2x256xf32, #tpu.memory_space<vmem>>, vector<2x1x256xf32>,
    return
  }
  func.func @transform_0(%arg0: i32) -> (i32, i32) {
    %c0_i32 = arith.constant 0 : i32
    %c0_i32_0 = arith.constant 0 : i32
    %c0_i32_1 = arith.constant 0 : i32
    return %c0_i32, %c0_i32_0 : i32, i32
  }
  func.func @transform_1(%arg0: i32) -> (i32, i32, i32) {
    %c0_i32 = arith.constant 0 : i32
    %c0_i32_0 = arith.constant 0 : i32
    %c0_i32_1 = arith.constant 0 : i32
    %c0_i32_2 = arith.constant 0 : i32
    return %c0_i32, %c0_i32_0, %c0_i32_1 : i32, i32, i32
  }
  func.func @transform_2(%arg0: i32) -> (i32, i32, i32) {
    %c0_i32 = arith.constant 0 : i32
    %c0_i32_0 = arith.constant 0 : i32
    %c0_i32_1 = arith.constant 0 : i32
    %c0_i32_2 = arith.constant 0 : i32
    return %c0_i32, %c0_i32_0, %c0_i32_1 : i32, i32, i32
  }
}

</mosaic_0001>

<bundles_post_ra>
// kernel: model_with_bn_forward.1
= control target key start
LH: loop header
LB: loop body
LE: loop exit
PB: predicated region body
PF: predicated region fallthrough
CT: control target
= control target key end

     0   :  { %7 = vsyncpa [#allocation3], 0  ;;  %s335_s12 = smov [#allocation2]   ;;  %s464_s0 = inlined_call_operand.vmem [shape: f32[4,2], index: 0, kind: input, shape index: {}]   ;;  %s465_s1 = inlined_call_operand.vmem [shape: f32[2,2,256], index: 1, kind: input, shape index: {}]   ;;  %s466_s2 = inlined_call_operand.vmem [shape: f32[2,2,256], index: 2, kind: output, shape index: {}]  }
   0x1   :  { %s13_s11 = sshll.u32 %s464_s0, 4  ;;  %s14_s11 = int_to_ptr.vmem [resolvable:$true] %s13_s11 }
   0x2   :  { %16 = dma.vmem_to_smem %s14_s11, 64, %s335_s12, [#allocation3]  }
   0x3   :  { %333 = dma.done.wait [#allocation3], 64  }
   0x4   :  { %334 = vsyncadd [#allocation3], 4294967232 }
   0x5   :  { %23 = sfence }
   0x6   :  { %v357_v0 = vld [vmem:[%s465_s1] ss:$2 sm:$0x3]  ;;  %v362_v1 = vld [vmem:[%s465_s1 + $0x4] ss:$2 sm:$0x3] }
   0x7   :  { %29 = vst [vmem:[#allocation1] ss:$9 sm:$0xff] %v357_v0  ;;  %v57_v2 = vmul.f32 %v357_v0, %v357_v0  ;;  %vm36_vm0 = vcmask 1041408   ;;  %v58_v3 = vmul.f32 %v362_v1, %v362_v1  ;;  %v375_v14 = vld [vmem:[%s465_s1 + $0x1] ss:$2 sm:$0x3] }
   0x8   :  { %31 = vst [vmem:[#allocation1 + $0x1] ss:$9 sm:$0xff] %v362_v1  ;;  %v380_v17 = vld [vmem:[%s465_s1 + $0x5] ss:$2 sm:$0x3]  ;;  %vm51_vm1 = vcmask 1040384   ;;  %v191_v35 = vmul.f32 %v375_v14, %v375_v14 }
   0x9   :  { %v192_v36 = vmul.f32 %v380_v17, %v380_v17  ;;  %s410_s1 = sld [smem:[#allocation2]] }
   0xa   :  { %s416_s20 = sld [smem:[#allocation2 + $0x1]] }
   0xb   :  { %s419_s21 = sld [smem:[#allocation2 + $0x80]] }
   0xc   :  { %s297_s22 = sld [smem:[#allocation2 + $0x100]] }
   0xd   :  { %s425_s23 = sld [smem:[#allocation2 + $0x81]] }
   0xe   :  { %s298_s26 = sld [smem:[#allocation2 + $0x180]] }
   0xf   :  { %v32_v4 = vld [vmem:[#allocation1] sm:$0xff]  ;;  %v33_v5 = vld [vmem:[#allocation1 + $0x9] sm:$0xff]  ;;  %s304_s27 = sld [smem:[#allocation2 + $0x101]] }
  0x10   :  { %v37_v6 = vsel %vm36_vm0, %v32_v4, 0.0  ;;  %v44_v7 = vsel %vm36_vm0, %v33_v5, 0.0  ;;  %61 = vst [vmem:[#allocation1] ss:$9 sm:$0xff] %v57_v2  ;;  %s305_s6 = sld [smem:[#allocation2 + $0x181]] }
  0x11   :  { %v38_v8 = vrot.slane %v37_v6, 4  ;;  %v45_v9 = vrot.slane %v44_v7, 4  ;;  %63 = vst [vmem:[#allocation1 + $0x1] ss:$9 sm:$0xff] %v58_v3  ;;  %s137_s24 = smul.f32 %s419_s21, %s410_s1 }
  0x13   :  { %v39_v10 = vadd.f32 %v38_v8, %v37_v6  ;;  %v46_v11 = vadd.f32 %v45_v9, %v44_v7  ;;  %s138_s25 = smul.f32 %s297_s22, %s137_s24 }
  0x14   :  { %s271_s28 = smul.f32 %s425_s23, %s416_s20 }
  0x15   :  { %v40_v12 = vrot.slane %v39_v10, 2  ;;  %v47_v13 = vrot.slane %v46_v11, 2 }
  0x16   :  { %s272_s29 = smul.f32 %s304_s27, %s271_s28 }
  0x17   :  { %v41_v15 = vadd.f32 %v40_v12, %v39_v10  ;;  %v48_v16 = vadd.f32 %v47_v13, %v46_v11 }
  0x18   :  { %v64_v18 = vld [vmem:[#allocation1] sm:$0xff]  ;;  %v65_v19 = vld [vmem:[#allocation1 + $0x9] sm:$0xff] }
  0x19   :  { %v42_v20 = vrot.slane %v41_v15, 1  ;;  %v49_v21 = vrot.slane %v48_v16, 1  ;;  %v68_v22 = vsel %vm36_vm0, %v64_v18, 0.0  ;;  %v75_v23 = vsel %vm36_vm0, %v65_v19, 0.0  ;;  %165 = vst [vmem:[#allocation1] ss:$9 sm:$0xff] %v375_v14 }
  0x1a   :  { %v69_v24 = vrot.slane %v68_v22, 4  ;;  %v76_v25 = vrot.slane %v75_v23, 4  ;;  %167 = vst [vmem:[#allocation1 + $0x1] ss:$9 sm:$0xff] %v380_v17 }
  0x1b   :  { %v43_v26 = vadd.f32 %v42_v20, %v41_v15  ;;  %v50_v27 = vadd.f32 %v49_v21, %v48_v16 }
  0x1c   :  { %v70_v28 = vadd.f32 %v69_v24, %v68_v22  ;;  %v77_v29 = vadd.f32 %v76_v25, %v75_v23 }
  0x1d   :  { %v52_v30 = vsel %vm51_vm1, %v43_v26, 0.0  ;;  %v53_v31 = vsel %vm51_vm1, %v50_v27, 0.0 }
  0x1e   :  { %v54_v32 = vadd.f32 %v53_v31, %v52_v30  ;;  %v71_v33 = vrot.slane %v70_v28, 2  ;;  %v78_v34 = vrot.slane %v77_v29, 2 }
  0x20   :  { %55 = vadd.xlane.f32.xlu0 %v54_v32  ;;  %v72_v37 = vadd.f32 %v71_v33, %v70_v28  ;;  %v79_v38 = vadd.f32 %v78_v34, %v77_v29 }
  0x21   :  { %v168_v39 = vld [vmem:[#allocation1] sm:$0xff]  ;;  %v169_v40 = vld [vmem:[#allocation1 + $0x9] sm:$0xff] }
  0x22   :  { %v73_v41 = vrot.slane %v72_v37, 1  ;;  %v80_v42 = vrot.slane %v79_v38, 1  ;;  %v172_v43 = vsel %vm36_vm0, %v168_v39, 0.0  ;;  %v179_v44 = vsel %vm36_vm0, %v169_v40, 0.0  ;;  %195 = vst [vmem:[#allocation1] ss:$9 sm:$0xff] %v191_v35 }
  0x23   :  { %v173_v45 = vrot.slane %v172_v43, 4  ;;  %v180_v46 = vrot.slane %v179_v44, 4  ;;  %197 = vst [vmem:[#allocation1 + $0x1] ss:$9 sm:$0xff] %v192_v36 }
  0x24   :  { %v74_v47 = vadd.f32 %v73_v41, %v72_v37  ;;  %v81_v48 = vadd.f32 %v80_v42, %v79_v38 }
  0x25   :  { %v174_v49 = vadd.f32 %v173_v45, %v172_v43  ;;  %v181_v50 = vadd.f32 %v180_v46, %v179_v44  ;;  %v107_v44 = vstv %s410_s1 }
  0x26   :  { %v82_v51 = vsel %vm51_vm1, %v74_v47, 0.0  ;;  %v83_v52 = vsel %vm51_vm1, %v81_v48, 0.0 }
  0x27   :  { %v84_v53 = vadd.f32 %v83_v52, %v82_v51  ;;  %v175_v54 = vrot.slane %v174_v49, 2  ;;  %v182_v55 = vrot.slane %v181_v50, 2 }
  0x29   :  { %85 = vadd.xlane.f32.xlu1 %v84_v53  ;;  %v176_v56 = vadd.f32 %v175_v54, %v174_v49  ;;  %v183_v57 = vadd.f32 %v182_v55, %v181_v50 }
  0x2a   :  { %v198_v58 = vld [vmem:[#allocation1] sm:$0xff]  ;;  %v199_v59 = vld [vmem:[#allocation1 + $0x9] sm:$0xff] }
  0x2b   :  { %v177_v60 = vrot.slane %v176_v56, 1  ;;  %v184_v61 = vrot.slane %v183_v57, 1  ;;  %v202_v62 = vsel %vm36_vm0, %v198_v58, 0.0  ;;  %v209_v63 = vsel %vm36_vm0, %v199_v59, 0.0 }
  0x2c   :  { %v203_v2 = vrot.slane %v202_v62, 4  ;;  %v210_v3 = vrot.slane %v209_v63, 4  ;;  %v241_v59 = vstv %s416_s20 }
  0x2d   :  { %v178_v4 = vadd.f32 %v177_v60, %v176_v56  ;;  %v185_v5 = vadd.f32 %v184_v61, %v183_v57 }
  0x2e   :  { %v204_v6 = vadd.f32 %v203_v2, %v202_v62  ;;  %v211_v7 = vadd.f32 %v210_v3, %v209_v63 }
  0x2f   :  { %v186_v8 = vsel %vm51_vm1, %v178_v4, 0.0  ;;  %v187_v9 = vsel %vm51_vm1, %v185_v5, 0.0 }
  0x30   :  { %v188_v10 = vadd.f32 %v187_v9, %v186_v8  ;;  %v205_v11 = vrot.slane %v204_v6, 2  ;;  %v212_v12 = vrot.slane %v211_v7, 2 }
  0x32   :  { %189 = vadd.xlane.f32.xlu0 %v188_v10  ;;  %v206_v13 = vadd.f32 %v205_v11, %v204_v6  ;;  %v213_v15 = vadd.f32 %v212_v12, %v211_v7  ;;  %v122_v6 = vstv %s419_s21 }
  0x34   :  { %v207_v16 = vrot.slane %v206_v13, 1  ;;  %v214_v18 = vrot.slane %v213_v15, 1 }
  0x36   :  { %v208_v19 = vadd.f32 %v207_v16, %v206_v13  ;;  %v215_v20 = vadd.f32 %v214_v18, %v213_v15 }
  0x38   :  { %v216_v21 = vsel %vm51_vm1, %v208_v19, 0.0  ;;  %v217_v22 = vsel %vm51_vm1, %v215_v20, 0.0 }
  0x39   :  { %v218_v23 = vadd.f32 %v217_v22, %v216_v21 }
  0x3b   :  { %219 = vadd.xlane.f32.xlu1 %v218_v23  ;;  %v256_v23 = vstv %s425_s23 }
  0x93   :  { %v56_v24 = vpop.xlane.xlu0 %55 }
  0x94   :  { %v402_v25 = vmul.f32 0.001953125, %v56_v24 }
  0x96   :  { %v89_v26 = vmul.f32 %v402_v25, %v402_v25 }
  0x9c   :  { %v86_v27 = vpop.xlane.xlu1 %85 }
  0x9d   :  { %v88_v28 = vmul.f32 0.001953125, %v86_v27 }
  0x9f   :  { %v90_v29 = vsub.f32 %v88_v28, %v89_v26 }
  0xa1   :  { %v91_v30 = vmax.f32 %v90_v29, 0.0  ;;  %v139_v29 = vstv %s138_s25 }
  0xa3   :  { %v96_v31 = vadd.f32 1e-05, %v91_v30 }
  0xa5   :  { %309 = vrsqrt.f32 %v96_v31  ;;  %v190_v32 = vpop.xlane.xlu0 %189  ;;  %vm103_vm2 = vweird.f32 %v96_v31 }
  0xa6   :  { %v406_v33 = vmul.f32 0.001953125, %v190_v32 }
  0xa8   :  { %v223_v36 = vmul.f32 %v406_v33, %v406_v33 }
  0xab   :  { %v310_v34 = vpop.eup %309 }
  0xac   :  { %v98_v35 = vmul.f32 %v310_v34, %v96_v31  ;;  %vm104_vm3 = vweird.f32 %v310_v34 }
  0xad   :  { %vm105_vm4 = vmor %vm103_vm2, %vm104_vm3 }
  0xae   :  { %v99_v37 = vmul.f32 %v310_v34, %v98_v35  ;;  %v220_v38 = vpop.xlane.xlu1 %219 }
  0xaf   :  { %v222_v39 = vmul.f32 0.001953125, %v220_v38 }
  0xb0   :  { %v100_v40 = vmul.f32 0.5, %v99_v37 }
  0xb1   :  { %v224_v41 = vsub.f32 %v222_v39, %v223_v36 }
  0xb2   :  { %v101_v42 = vsub.f32 1.5, %v100_v40 }
  0xb3   :  { %v225_v43 = vmax.f32 %v224_v41, 0.0  ;;  %v144_v41 = vstv %s298_s26 }
  0xb4   :  { %v102_v45 = vmul.f32 %v310_v34, %v101_v42 }
  0xb5   :  { %v230_v46 = vadd.f32 1e-05, %v225_v43 }
  0xb6   :  { %v413_v47 = vsel %vm105_vm4, %v310_v34, %v102_v45 }
  0xb7   :  { %v108_v48 = vmul.f32 %v107_v44, %v413_v47  ;;  %311 = vrsqrt.f32 %v230_v46  ;;  %vm237_vm6 = vweird.f32 %v230_v46  ;;  %v140_v34 = vmul.f32 %v139_v29, %v413_v47 }
  0xb8   :  { %v152_v44 = vlaneseq }
  0xb9   :  { %v109_v49 = vmul.f32 %v108_v48, %v108_v48 }
  0xba   :  { %vm436_vm1 = vcmp.lt.s32.totalorder %v152_v44, 256 }
  0xbb   :  { %v110_v50 = vmul.f32 %v109_v49, %v91_v30 }
  0xbd   :  { %v312_v51 = vpop.eup %311  ;;  %v111_v52 = vadd.f32 1e-05, %v110_v50 }
  0xbe   :  { %v232_v53 = vmul.f32 %v312_v51, %v230_v46  ;;  %vm238_vm5 = vweird.f32 %v312_v51 }
  0xbf   :  { %313 = vrsqrt.f32 %v111_v52  ;;  %vm239_vm7 = vmor %vm237_vm6, %vm238_vm5  ;;  %vm118_vm9 = vweird.f32 %v111_v52 }
  0xc0   :  { %v233_v54 = vmul.f32 %v312_v51, %v232_v53 }
  0xc2   :  { %v234_v55 = vmul.f32 0.5, %v233_v54 }
  0xc4   :  { %v235_v56 = vsub.f32 1.5, %v234_v55 }
  0xc5   :  { %v314_v57 = vpop.eup %313 }
  0xc6   :  { %v113_v58 = vmul.f32 %v314_v57, %v111_v52  ;;  %v236_v60 = vmul.f32 %v312_v51, %v235_v56  ;;  %vm119_vm8 = vweird.f32 %v314_v57 }
  0xc7   :  { %vm120_vm10 = vmor %vm118_vm9, %vm119_vm8 }
  0xc8   :  { %v114_v61 = vmul.f32 %v314_v57, %v113_v58  ;;  %v421_v62 = vsel %vm239_vm7, %v312_v51, %v236_v60  ;;  %v278_v60 = vstv %s305_s6 }
  0xc9   :  { %v242_v63 = vmul.f32 %v241_v59, %v421_v62 }
  0xca   :  { %v115_v2 = vmul.f32 0.5, %v114_v61 }
  0xcb   :  { %v243_v3 = vmul.f32 %v242_v63, %v242_v63 }
  0xcc   :  { %v116_v4 = vsub.f32 1.5, %v115_v2 }
  0xcd   :  { %v244_v5 = vmul.f32 %v243_v3, %v225_v43 }
  0xce   :  { %v117_v7 = vmul.f32 %v314_v57, %v116_v4 }
  0xcf   :  { %v245_v8 = vadd.f32 1e-05, %v244_v5 }
  0xd0   :  { %v121_v9 = vsel %vm120_vm10, %v314_v57, %v117_v7 }
  0xd1   :  { %v123_v10 = vmul.f32 %v122_v6, %v121_v9  ;;  %315 = vrsqrt.f32 %v245_v8  ;;  %vm252_vm12 = vweird.f32 %v245_v8  ;;  %v141_v37 = vmul.f32 %v140_v34, %v121_v9 }
  0xd3   :  { %v124_v11 = vmul.f32 %v123_v10, %v123_v10 }
  0xd5   :  { %v125_v12 = vmul.f32 %v124_v11, %v110_v50 }
  0xd7   :  { %v316_v13 = vpop.eup %315  ;;  %v126_v15 = vadd.f32 1e-05, %v125_v12 }
  0xd8   :  { %v247_v16 = vmul.f32 %v316_v13, %v245_v8  ;;  %vm253_vm11 = vweird.f32 %v316_v13 }
  0xd9   :  { %317 = vrsqrt.f32 %v126_v15  ;;  %vm254_vm13 = vmor %vm252_vm12, %vm253_vm11  ;;  %vm133_vm15 = vweird.f32 %v126_v15 }
  0xda   :  { %v248_v18 = vmul.f32 %v316_v13, %v247_v16 }
  0xdc   :  { %v249_v19 = vmul.f32 0.5, %v248_v18 }
  0xde   :  { %v250_v20 = vsub.f32 1.5, %v249_v19 }
  0xdf   :  { %v318_v21 = vpop.eup %317 }
  0xe0   :  { %v128_v22 = vmul.f32 %v318_v21, %v126_v15  ;;  %v251_v24 = vmul.f32 %v316_v13, %v250_v20  ;;  %vm134_vm14 = vweird.f32 %v318_v21 }
  0xe1   :  { %vm135_vm0 = vmor %vm133_vm15, %vm134_vm14 }
  0xe2   :  { %v129_v26 = vmul.f32 %v318_v21, %v128_v22  ;;  %v255_v27 = vsel %vm254_vm13, %v316_v13, %v251_v24 }
  0xe3   :  { %v257_v28 = vmul.f32 %v256_v23, %v255_v27 }
  0xe4   :  { %v130_v30 = vmul.f32 0.5, %v129_v26 }
  0xe5   :  { %v258_v31 = vmul.f32 %v257_v28, %v257_v28 }
  0xe6   :  { %v131_v32 = vsub.f32 1.5, %v130_v30 }
  0xe7   :  { %v259_v35 = vmul.f32 %v258_v31, %v244_v5 }
  0xe8   :  { %v132_v36 = vmul.f32 %v318_v21, %v131_v32 }
  0xe9   :  { %v260_v38 = vadd.f32 1e-05, %v259_v35 }
  0xea   :  { %v136_v39 = vsel %vm135_vm0, %v318_v21, %v132_v36 }
  0xeb   :  { %v142_v40 = vmul.f32 %v141_v37, %v136_v39  ;;  %319 = vrsqrt.f32 %v260_v38  ;;  %vm267_vm3 = vweird.f32 %v260_v38 }
  0xed   :  { %v143_v42 = vmul.f32 %v142_v40, %v402_v25  ;;  %v146_v43 = vperm.slane %v142_v40, 0 }
  0xef   :  { %v145_v45 = vsub.f32 %v144_v41, %v143_v42  ;;  %v147_v47 = vmul.f32 %v146_v43, %v357_v0  ;;  %v148_v48 = vmul.f32 %v362_v1, %v146_v43  ;;  %v273_v0 = vstv %s272_s29 }
  0xf0   :  { %v274_v55 = vmul.f32 %v273_v0, %v421_v62 }
  0xf1   :  { %v320_v46 = vpop.eup %319  ;;  %v149_v49 = vperm.slane %v145_v45, 0 }
  0xf2   :  { %v262_v51 = vmul.f32 %v320_v46, %v260_v38  ;;  %vm268_vm2 = vweird.f32 %v320_v46  ;;  %v275_v57 = vmul.f32 %v274_v55, %v255_v27 }
  0xf3   :  { %v150_v52 = vadd.f32 %v149_v49, %v147_v47  ;;  %v151_v53 = vadd.f32 %v149_v49, %v148_v48  ;;  %vm269_vm4 = vmor %vm267_vm3, %vm268_vm2 }
  0xf4   :  { %v263_v54 = vmul.f32 %v320_v46, %v262_v51 }
  0xf5   :  { %156 = vst.msk [vmem:[%s466_s2] ss:$2 sm:$0x3] %vm436_vm1, %v150_v52 }
  0xf6   :  { %299 = vst.msk [vmem:[%s466_s2 + $0x4] ss:$2 sm:$0x3] %vm436_vm1, %v151_v53  ;;  %v264_v1 = vmul.f32 0.5, %v263_v54 }
  0xf8   :  { %v265_v25 = vsub.f32 1.5, %v264_v1 }
  0xfa   :  { %v266_v56 = vmul.f32 %v320_v46, %v265_v25 }
  0xfc   :  { %v270_v58 = vsel %vm269_vm4, %v320_v46, %v266_v56 }
  0xfd   :  { %v276_v59 = vmul.f32 %v275_v57, %v270_v58 }
  0xff   :  { %v277_v61 = vmul.f32 %v276_v59, %v406_v33  ;;  %v280_v63 = vperm.slane %v276_v59, 0 }
 0x101   :  { %v279_v2 = vsub.f32 %v278_v60, %v277_v61  ;;  %v281_v3 = vmul.f32 %v375_v14, %v280_v63  ;;  %v282_v4 = vmul.f32 %v380_v17, %v280_v63 }
 0x103   :  { %v283_v5 = vperm.slane %v279_v2, 0 }
 0x105   :  { %v284_v6 = vadd.f32 %v283_v5, %v281_v3  ;;  %v285_v7 = vadd.f32 %v283_v5, %v282_v4 }
 0x107   :  { %306 = vst.msk [vmem:[%s466_s2 + $0x1] ss:$2 sm:$0x3] %vm436_vm1, %v284_v6 }
 0x108   :  { %307 = vst.msk [vmem:[%s466_s2 + $0x5] ss:$2 sm:$0x3] %vm436_vm1, %v285_v7 }
 0x109   :  { %294 = vsyncpa [#allocation3], 1 }

</bundles_post_ra>
